<compile_context>
chip_gen: v5e
topology: v5e:2x2
jax: 0.10.0
libtpu: 0.0.40
codegen_flags: <defaults>
</compile_context>

<pallas_src>
import functools

import jax
import jax.numpy as jnp
from jax import lax
from jax.experimental import pallas as pl
from jax.experimental.pallas import tpu as pltpu


_SUBLANE = 16  # lcm of the f32 (8) and bf16 (16) sublane tiles


def _round_up(n, m):
    return ((n + m - 1) // m) * m


# --------------------------------- kernel ------------------------------------

def layer_norm_kernel(x_ref, g_ref, b_ref, o_ref, *, affine_in_io_dtype):
    # x_ref: (row_tile, D) tile of the flattened input
    # g_ref / b_ref: (1, D) gamma / beta (constant across the grid)
    x_in = x_ref[...]
    xf = x_in.astype(jnp.float32)

    inv_d = 1.0 / xf.shape[-1]                      # compile-time constant
    # Fused statistics: one pass over x, two cross-lane reductions total.
    s = jnp.sum(xf, axis=-1, keepdims=True)
    ss = jnp.sum(xf * xf, axis=-1, keepdims=True)
    mean = s * inv_d
    # E[x^2] - mean^2 (unbiased=False); clamp to avoid NaN from fp cancellation.
    var = jnp.maximum(ss * inv_d - mean * mean, 0.0)
    # Reference forward uses no eps; rsqrt goes to the EUP slot (free).
    r = lax.rsqrt(var)

    if affine_in_io_dtype:
        # bf16 normalization + affine pass (native bf16 VPU on v6e/v7x);
        # statistics stayed in f32 above.
        dt = x_in.dtype
        out = (x_in - mean.astype(dt)) * r.astype(dt)
        o_ref[...] = (g_ref[...].astype(dt) * out + b_ref[...].astype(dt)
                      ).astype(o_ref.dtype)
    else:
        g = g_ref[...].astype(jnp.float32)          # hoisted: read once
        b = b_ref[...].astype(jnp.float32)
        out = (xf - mean) * r
        o_ref[...] = (g * out + b).astype(o_ref.dtype)


# --------------------------------- wrapper -----------------------------------

def _choose_tiling(N, D, dtype):
    """Pick a byte-sized row tile + VMEM limit that is safe on v5e/v6e/v7x."""
    dsz = jnp.dtype(dtype).itemsize

    # ~4 MiB x-block target: measured sweet spot for HBM-bound Pallas kernels.
    target_block_bytes = 4 << 20
    rt = max(1, target_block_bytes // (D * dsz))

    # Keep total VMEM footprint (2x in + 2x out + f32 temps) under ~40 MiB so
    # the tile fits comfortably inside v7x's 64 MiB physical VMEM per core.
    vmem_budget = 40 << 20
    per_row_bytes = D * (4 * dsz + 3 * 4)
    rt = min(rt, max(1, vmem_budget // per_row_bytes))

    # At least 2 grid steps so the "parallel" axis shards across v7x's 2 TCs.
    rt = min(rt, pl.cdiv(N, 2))

    rt = max(rt, 1)
    rt = _round_up(rt, _SUBLANE)
    rt = min(rt, _round_up(N, _SUBLANE))

    grid = pl.cdiv(N, rt)
    block_bytes = rt * D * dsz
    vmem_limit = int(min(48 << 20,
                         max(16 << 20,
                             4 * block_bytes + 3 * rt * D * 4 + (2 << 20))))
    return rt, grid, block_bytes, vmem_limit


def layer_norm_pallas(x, gamma, beta, *, row_tile=None):
    """LayerNorm over the last axis of x. gamma/beta: (d_model,)."""
    orig_shape = x.shape
    D = orig_shape[-1]
    x2 = x.reshape(-1, D)
    N = x2.shape[0]

    if row_tile is None:
        rt, grid, block_bytes, vmem_limit = _choose_tiling(N, D, x.dtype)
    else:
        rt = min(_round_up(row_tile, _SUBLANE), _round_up(N, _SUBLANE))
        grid = pl.cdiv(N, rt)
        block_bytes = rt * D * jnp.dtype(x.dtype).itemsize
        vmem_limit = int(min(48 << 20,
                             max(16 << 20,
                                 4 * block_bytes + 3 * rt * D * 4 + (2 << 20))))

    g2 = gamma.reshape(1, D)
    b2 = beta.reshape(1, D)

    # No wrapper-side padding: Pallas masks the ragged last block. Rows are
    # independent, so the masked-out rows never affect valid output rows.
    x_spec = pl.BlockSpec((rt, D), lambda i: (i, 0))
    if block_bytes < (1 << 20) and grid >= 4:
        # Blocks are small and there are many steps: hide DMA issue latency
        # with deeper pipelining on the x input.
        x_spec = pl.BlockSpec((rt, D), lambda i: (i, 0),
                              pipeline_mode=pl.Buffered(3))

    affine_in_io_dtype = (jnp.dtype(x.dtype) == jnp.dtype(jnp.bfloat16))
    kernel = functools.partial(layer_norm_kernel,
                               affine_in_io_dtype=affine_in_io_dtype)

    out = pl.pallas_call(
        kernel,
        out_shape=jax.ShapeDtypeStruct((N, D), x.dtype),
        grid=(grid,),
        in_specs=[
            x_spec,                                     # x row tile
            pl.BlockSpec((1, D), lambda i: (0, 0)),     # gamma
            pl.BlockSpec((1, D), lambda i: (0, 0)),     # beta
        ],
        out_specs=pl.BlockSpec((rt, D), lambda i: (i, 0)),
        compiler_params=pltpu.CompilerParams(
            dimension_semantics=("parallel",),
            vmem_limit_bytes=vmem_limit),
    )(x2, g2, b2)

    return out.reshape(orig_shape)


# ----------------------------------- main ------------------------------------

if __name__ == "__main__":
    # Small shapes consistent with the module; d_model kept lane-dense (128-mult).
    B, T, d_model = 2, 8, 256

    key = jax.random.PRNGKey(0)
    kx, kg, kb = jax.random.split(key, 3)
    x = jax.random.normal(kx, (B, T, d_model), jnp.float32)
    gamma = 1.0 + 0.1 * jax.random.normal(kg, (d_model,), jnp.float32)
    beta = 0.1 * jax.random.normal(kb, (d_model,), jnp.float32)

    out = layer_norm_pallas(x, gamma, beta)
    jax.block_until_ready(out)

    # Pure-JAX reference (matches the PyTorch module exactly: unbiased=False, no eps).
    mean = jnp.mean(x, axis=-1, keepdims=True)
    var = jnp.mean(jnp.square(x - mean), axis=-1, keepdims=True)
    ref = gamma * ((x - mean) / jnp.sqrt(var)) + beta

    assert out.shape == (B, T, d_model), out.shape
    assert jnp.all(jnp.isfinite(out))
    assert jnp.allclose(out, ref, atol=1e-4, rtol=1e-4), float(
        jnp.max(jnp.abs(out - ref)))
    print("KERNEL_OK")
</pallas_src>

<mosaic_0001>
module attributes {stable_mosaic.version = 11 : i64} {
  func.func @layer_norm_kernel(%arg0: i32, %arg1: memref<16x256xf32, #tpu.memory_space<vmem>>, %arg2: memref<1x256xf32, #tpu.memory_space<vmem>>, %arg3: memref<1x256xf32, #tpu.memory_space<vmem>>, %arg4: memref<16x256xf32, #tpu.memory_space<vmem>>) attributes {dimension_semantics = [#tpu.dimension_semantics<parallel>], iteration_bounds = array<i64: 1>, scalar_prefetch = 0 : i64, scratch_operands = 0 : i64, tpu.core_type = #tpu.core_type<tc>, window_params = [{transform_indices = @transform_0, window_bounds = array<i64: 16, 256>}, {pipeline_mode = #tpu.pipeline_mode<synchronous>, transform_indices = @transform_1, window_bounds = array<i64: 1, 256>}, {pipeline_mode = #tpu.pipeline_mode<synchronous>, transform_indices = @transform_2, window_bounds = array<i64: 1, 256>}, {transform_indices = @transform_3, window_bounds = array<i64: 16, 256>}]} {
    %c0 = arith.constant 0 : index
    %c0_0 = arith.constant 0 : index
    %0 = vector.load %arg1[%c0, %c0_0] : memref<16x256xf32, #tpu.memory_space<vmem>>, vector<16x256xf32>
    %cst = arith.constant dense<0.000000e+00> : vector<16xf32>
    %1 = vector.multi_reduction <add>, %0, %cst [1] : vector<16x256xf32> to vector<16xf32>
    %2 = vector.shape_cast %1 : vector<16xf32> to vector<16x1xf32>
    %3 = arith.mulf %0, %0 : vector<16x256xf32>
    %cst_1 = arith.constant dense<0.000000e+00> : vector<16xf32>
    %4 = vector.multi_reduction <add>, %3, %cst_1 [1] : vector<16x256xf32> to vector<16xf32>
    %5 = vector.shape_cast %4 : vector<16xf32> to vector<16x1xf32>
    %cst_2 = arith.constant 3.906250e-03 : f32
    %6 = vector.broadcast %cst_2 : f32 to vector<16x1xf32>
    %7 = arith.mulf %2, %6 : vector<16x1xf32>
    %cst_3 = arith.constant 3.906250e-03 : f32
    %8 = vector.broadcast %cst_3 : f32 to vector<16x1xf32>
    %9 = arith.mulf %5, %8 : vector<16x1xf32>
    %10 = arith.mulf %7, %7 : vector<16x1xf32>
    %11 = arith.subf %9, %10 : vector<16x1xf32>
    %cst_4 = arith.constant 0.000000e+00 : f32
    %12 = vector.broadcast %cst_4 : f32 to vector<16x1xf32>
    %13 = arith.maximumf %11, %12 : vector<16x1xf32>
    %14 = math.rsqrt %13 : vector<16x1xf32>
    %c0_5 = arith.constant 0 : index
    %c0_6 = arith.constant 0 : index
    %15 = vector.load %arg2[%c0_5, %c0_6] : memref<1x256xf32, #tpu.memory_space<vmem>>, vector<1x256xf32>
    %c0_7 = arith.constant 0 : index
    %c0_8 = arith.constant 0 : index
    %16 = vector.load %arg3[%c0_7, %c0_8] : memref<1x256xf32, #tpu.memory_space<vmem>>, vector<1x256xf32>
    %17 = vector.broadcast %7 : vector<16x1xf32> to vector<16x256xf32>
    %18 = arith.subf %0, %17 : vector<16x256xf32>
    %19 = vector.broadcast %14 : vector<16x1xf32> to vector<16x256xf32>
    %20 = arith.mulf %18, %19 : vector<16x256xf32>
    %21 = vector.broadcast %15 : vector<1x256xf32> to vector<16x256xf32>
    %22 = arith.mulf %21, %20 : vector<16x256xf32>
    %23 = vector.broadcast %16 : vector<1x256xf32> to vector<16x256xf32>
    %24 = arith.addf %22, %23 : vector<16x256xf32>
    %c0_9 = arith.constant 0 : index
    %c0_10 = arith.constant 0 : index
    %25 = vector.load %arg4[%c0_9, %c0_10] : memref<16x256xf32, #tpu.memory_space<vmem>>, vector<16x256xf32>
    tpu.vector_store %arg4[%c0_9, %c0_10], %24 {strides = array<i32>} : memref<16x256xf32, #tpu.memory_space<vmem>>, vector<16x256xf32>,
    return
  }
  func.func @transform_0(%arg0: i32) -> (i32, i32) {
    %c0_i32 = arith.constant 0 : i32
    %c0_i32_0 = arith.constant 0 : i32
    return %arg0, %c0_i32 : i32, i32
  }
  func.func @transform_1(%arg0: i32) -> (i32, i32) {
    %c0_i32 = arith.constant 0 : i32
    %c0_i32_0 = arith.constant 0 : i32
    %c0_i32_1 = arith.constant 0 : i32
    return %c0_i32, %c0_i32_0 : i32, i32
  }
  func.func @transform_2(%arg0: i32) -> (i32, i32) {
    %c0_i32 = arith.constant 0 : i32
    %c0_i32_0 = arith.constant 0 : i32
    %c0_i32_1 = arith.constant 0 : i32
    return %c0_i32, %c0_i32_0 : i32, i32
  }
  func.func @transform_3(%arg0: i32) -> (i32, i32) {
    %c0_i32 = arith.constant 0 : i32
    %c0_i32_0 = arith.constant 0 : i32
    return %arg0, %c0_i32 : i32, i32
  }
}

</mosaic_0001>

<bundles_post_ra>
// kernel: tpu_custom_call.1
= control target key start
LH: loop header
LB: loop body
LE: loop exit
PB: predicated region body
PF: predicated region fallthrough
CT: control target
= control target key end

     0   :  { %8 = vsyncpa [#allocation3], 0  ;;  %s328_s0 = inlined_call_operand.hbm [shape: f32[16,256], index: 0, kind: input, shape index: {}]   ;;  %s329_s1 = inlined_call_operand.hbm [shape: f32[1,256], index: 1, kind: input, shape index: {}]   ;;  %s330_s2 = inlined_call_operand.hbm [shape: f32[1,256], index: 2, kind: input, shape index: {}]   ;;  %s331_s3 = inlined_call_operand.hbm [shape: f32[16,256], index: 3, kind: output, shape index: {}]  }
   0x1   :  { %9 = vsyncpa [#allocation6], 0  ;;  %s29_s14 = sshll.u32 %s329_s1, 4  ;;  %s30_s14 = int_to_ptr.hbm [resolvable:$true] %s29_s14 }
   0x2   :  { %10 = vsyncpa [#allocation4], 0  ;;  %s272_s15 = smov [#allocation5]   ;;  %s15_s19 = sshll.u32 %s328_s0, 4  ;;  %s16_s19 = int_to_ptr.hbm [resolvable:$true] %s15_s19 }
   0x3   :  { %s31_s16 = sshll.u32 %s272_s15, 4  ;;  %s273_s20 = smov [#allocation2]   ;;  %s32_s16 = int_to_ptr.vmem [resolvable:$true] %s31_s16 }
   0x4   :  { %34 = dma.hbm_to_vmem [thread:$0]  %s30_s14, 32, %s32_s16, [#allocation6]  }
   0x5   :  { %s17_s21 = sshll.u32 %s273_s20, 4  ;;  %s274_s22 = smov 256   ;;  %s18_s21 = int_to_ptr.vmem [resolvable:$true] %s17_s21 }
   0x6   :  { %s275_s23 = smov 16   ;;  %s40_s25 = sshll.u32 %s330_s2, 4  ;;  %s41_s25 = int_to_ptr.hbm [resolvable:$true] %s40_s25 }
   0x7   :  { %23 = dma.hbm_to_vmem [thread:$0]  %s16_s19, 512, %s18_s21, [#allocation3], %s274_s22, %s274_s22, %s275_s23  }
   0x8   :  { %s276_s26 = smov [#allocation7]  }
   0x9   :  { %s42_s27 = sshll.u32 %s276_s26, 4  ;;  %s43_s27 = int_to_ptr.vmem [resolvable:$true] %s42_s27 }
   0xa   :  { %45 = dma.hbm_to_vmem [thread:$0]  %s41_s25, 32, %s43_s27, [#allocation6]  }
   0xb   :  { %266 = dma.done.wait [#allocation3], 512  }
   0xc   :  { %267 = vsyncadd [#allocation3], 4294966784 }
   0xd   :  { %268 = dma.done.wait [#allocation6], 64  }
   0xe   :  { %269 = vsyncadd [#allocation6], 4294967232  ;;  %v58_v0 = vld [vmem:[#allocation2] sm:$0xff]  ;;  %v59_v1 = vld [vmem:[#allocation2 + $0x8] sm:$0xff]  ;;  %s277_s0 = smov [#allocation8]   ;;  %s146_s30 = sshll.u32 %s331_s3, 4  ;;  %s147_s30 = int_to_ptr.hbm [resolvable:$true] %s146_s30 }
   0xf   :  { %v62_v2 = vadd.f32 %v59_v1, %v58_v0  ;;  %v68_v3 = vmul.f32 %v58_v0, %v58_v0  ;;  %v69_v4 = vmul.f32 %v59_v1, %v59_v1  ;;  %v310_v5 = vld [vmem:[#allocation2 + $0x10] sm:$0xff]  ;;  %v312_v6 = vld [vmem:[#allocation2 + $0x18] sm:$0xff]  ;;  %v108_v30 = vld [vmem:[#allocation5] sm:$0x3]  ;;  %s144_s2 = sshll.u32 %s277_s0, 4  ;;  %s145_s2 = int_to_ptr.vmem [resolvable:$true] %s144_s2 }
  0x10   :  { %v70_v8 = vmul.f32 %v310_v5, %v310_v5  ;;  %v71_v9 = vmul.f32 %v312_v6, %v312_v6  ;;  %v65_v10 = vadd.f32 %v312_v6, %v310_v5  ;;  %v109_v35 = vld [vmem:[#allocation7] sm:$0x3]  ;;  %v119_v38 = vperm.slane %v108_v30, 0 }
  0x11   :  { %63 = vadd.xlane.f32.xlu0 %v62_v2  ;;  %v72_v7 = vadd.f32 %v69_v4, %v68_v3  ;;  %v120_v39 = vperm.slane %v108_v30, 1  ;;  %v128_v44 = vperm.slane %v109_v35, 0  ;;  %v129_v45 = vperm.slane %v109_v35, 1 }
  0x12   :  { %v75_v11 = vadd.f32 %v71_v9, %v70_v8 }
  0x13   :  { %73 = vadd.xlane.f32.xlu1 %v72_v7 }
  0x19   :  { %66 = vadd.xlane.f32.xlu0 %v65_v10 }
  0x1b   :  { %76 = vadd.xlane.f32.xlu1 %v75_v11 }
  0x84   :  { %v64_v12 = vpop.xlane.xlu0 %63 }
  0x85   :  { %v78_v13 = vmul.f32 0.00390625, %v64_v12 }
  0x86   :  { %v74_v14 = vpop.xlane.xlu1 %73 }
  0x87   :  { %v80_v15 = vmul.f32 0.00390625, %v74_v14  ;;  %v82_v16 = vmul.f32 %v78_v13, %v78_v13  ;;  %v110_v36 = vsub.f32 %v58_v0, %v78_v13  ;;  %v111_v37 = vsub.f32 %v59_v1, %v78_v13 }
  0x89   :  { %v84_v17 = vsub.f32 %v80_v15, %v82_v16 }
  0x8b   :  { %v86_v18 = vmax.f32 %v84_v17, 0.0 }
  0x8c   :  { %v67_v19 = vpop.xlane.xlu0 %66 }
  0x8d   :  { %166 = vrsqrt.f32 %v86_v18  ;;  %v79_v20 = vmul.f32 0.00390625, %v67_v19  ;;  %vm94_vm1 = vweird.f32 %v86_v18 }
  0x8e   :  { %v77_v21 = vpop.xlane.xlu1 %76 }
  0x8f   :  { %v81_v22 = vmul.f32 0.00390625, %v77_v21  ;;  %v83_v23 = vmul.f32 %v79_v20, %v79_v20  ;;  %v112_v53 = vsub.f32 %v310_v5, %v79_v20  ;;  %v113_v54 = vsub.f32 %v312_v6, %v79_v20 }
  0x91   :  { %v85_v24 = vsub.f32 %v81_v22, %v83_v23 }
  0x93   :  { %v167_v25 = vpop.eup %166  ;;  %v87_v26 = vmax.f32 %v85_v24, 0.0 }
  0x94   :  { %v89_v27 = vmul.f32 %v167_v25, %v86_v18  ;;  %vm95_vm0 = vweird.f32 %v167_v25 }
  0x95   :  { %168 = vrsqrt.f32 %v87_v26  ;;  %vm96_vm2 = vmor %vm94_vm1, %vm95_vm0  ;;  %vm104_vm4 = vweird.f32 %v87_v26 }
  0x96   :  { %v90_v28 = vmul.f32 %v167_v25, %v89_v27 }
  0x98   :  { %v91_v29 = vmul.f32 0.5, %v90_v28 }
  0x9a   :  { %v92_v31 = vsub.f32 1.5, %v91_v29 }
  0x9b   :  { %v169_v32 = vpop.eup %168 }
  0x9c   :  { %v93_v33 = vmul.f32 %v167_v25, %v92_v31  ;;  %v99_v34 = vmul.f32 %v169_v32, %v87_v26  ;;  %vm105_vm3 = vweird.f32 %v169_v32 }
  0x9d   :  { %vm106_vm5 = vmor %vm104_vm4, %vm105_vm3 }
  0x9e   :  { %v97_v40 = vsel %vm96_vm2, %v167_v25, %v93_v33  ;;  %v100_v41 = vmul.f32 %v169_v32, %v99_v34 }
  0x9f   :  { %v114_v42 = vmul.f32 %v110_v36, %v97_v40  ;;  %v115_v43 = vmul.f32 %v111_v37, %v97_v40 }
  0xa0   :  { %v101_v46 = vmul.f32 0.5, %v100_v41 }
  0xa1   :  { %v123_v47 = vmul.f32 %v119_v38, %v114_v42  ;;  %v124_v48 = vmul.f32 %v120_v39, %v115_v43 }
  0xa2   :  { %v102_v49 = vsub.f32 1.5, %v101_v46 }
  0xa3   :  { %v132_v50 = vadd.f32 %v128_v44, %v123_v47  ;;  %v133_v51 = vadd.f32 %v129_v45, %v124_v48 }
  0xa4   :  { %v103_v52 = vmul.f32 %v169_v32, %v102_v49 }
  0xa5   :  { %136 = vst [vmem:[#allocation8] sm:$0xff] %v132_v50 }
  0xa6   :  { %v107_v55 = vsel %vm106_vm5, %v169_v32, %v103_v52  ;;  %137 = vst [vmem:[#allocation8 + $0x8] sm:$0xff] %v133_v51 }
  0xa7   :  { %v116_v56 = vmul.f32 %v112_v53, %v107_v55  ;;  %v117_v57 = vmul.f32 %v113_v54, %v107_v55 }
  0xa9   :  { %v125_v58 = vmul.f32 %v119_v38, %v116_v56  ;;  %v126_v59 = vmul.f32 %v120_v39, %v117_v57 }
  0xab   :  { %v134_v60 = vadd.f32 %v128_v44, %v125_v58  ;;  %v135_v61 = vadd.f32 %v129_v45, %v126_v59 }
  0xad   :  { %138 = vst [vmem:[#allocation8 + $0x10] sm:$0xff] %v134_v60 }
  0xae   :  { %139 = vst [vmem:[#allocation8 + $0x18] sm:$0xff] %v135_v61 }
  0xaf   :  { %152 = dma.vmem_to_hbm [thread:$0]  %s145_s2, 512, %s147_s30, [#allocation4], %s274_s22, %s274_s22, %s275_s23  }
  0xb0   :  { %270 = dma.done.wait [#allocation4], 512  }
  0xb1   :  { %271 = vsyncadd [#allocation4], 4294966784 }
  0xb2   :  { %157 = vsyncpa [#allocation3], 1 }
  0xb3   :  { %158 = vsyncpa [#allocation6], 1 }
  0xb4   :  { %159 = vsyncpa [#allocation4], 1 }

</bundles_post_ra>
